<compile_context>
chip_gen: v6e
topology: v6e:2x2x1
jax: 0.10.0
libtpu: 0.0.40
codegen_flags: <defaults>
</compile_context>

<pallas_src>
import functools

import jax
import jax.numpy as jnp
from jax.experimental import pallas as pl
from jax.experimental.pallas import tpu as pltpu


HIDDEN = 100       # logical hidden size (matches the PyTorch module)
HIDDEN_PAD = 128   # padded to a full lane width / MXU column
MAX_TILE_B = 4096  # batch tile cap (safe for v7x 64 MiB VMEM, double-buffered)


def _round_up(v, m):
    return (v + m - 1) // m * m


def vae_tabular_kernel(
    x_ref, a_ref, eps_ref,
    we_ref, be_ref,            # encoder trunk: input_dim -> 128 (padded)
    wmlv_ref, bmlv_ref,        # fused fc1|fc2 head: 128 -> 2*latent
    wd1_ref, bd1_ref,          # decoder L1: latent -> 128 (padded)
    wd2_ref, bd2_ref,          # decoder L2 as a (1,128) row
    wfz_ref, wfa_ref, bf1_ref, # fair decoder L1 split: z-part + a-part
    wf2_ref, bf2_ref,          # fair decoder L2 as a (1,128) row
    out_ref,                   # packed [mu | logvar | yhat | yfair]
):
    latent = eps_ref.shape[1]

    x = x_ref[...]                              # bf16 (T, input_dim)
    a = a_ref[...]                              # f32  (T, 1)
    eps = eps_ref[...].astype(jnp.float32)      # f32  (T, latent)

    # Encoder trunk: h = ReLU(x @ We + be), f32 accumulate on MXU.
    h = jnp.maximum(
        jnp.dot(x, we_ref[...], preferred_element_type=jnp.float32) + be_ref[...],
        0.0,
    )
    h_bf = h.astype(jnp.bfloat16)

    # Fused mu|logvar head: one (128, 2*latent) matmul.
    mlv = jnp.dot(h_bf, wmlv_ref[...], preferred_element_type=jnp.float32) + bmlv_ref[...]
    mu = mlv[:, :latent]
    logvar = mlv[:, latent:]

    # Reparametrize in f32: z = mu + exp(0.5*logvar) * eps
    z = mu + jnp.exp(0.5 * logvar) * eps
    z_bf = z.astype(jnp.bfloat16)

    # Decoder: hd = ReLU(z @ Wd1 + bd1); yhat = <hd, wd2_row> + bd2
    hd = jnp.maximum(
        jnp.dot(z_bf, wd1_ref[...], preferred_element_type=jnp.float32) + bd1_ref[...],
        0.0,
    )
    yhat = jnp.sum(hd * wd2_ref[...], axis=-1, keepdims=True) + bd2_ref[...]

    # Fair decoder: concat([z, a], 1) @ Wf1 == z @ Wf1[:L] + a * Wf1[L:]
    hf = jnp.maximum(
        jnp.dot(z_bf, wfz_ref[...], preferred_element_type=jnp.float32)
        + a * wfa_ref[...]
        + bf1_ref[...],
        0.0,
    )
    yfair = jnp.sum(hf * wf2_ref[...], axis=-1, keepdims=True) + bf2_ref[...]

    # Single lane-dense packed store: [mu | logvar | yhat | yfair]
    out_ref[...] = jnp.concatenate([mlv, yhat, yfair], axis=-1)


def pack_params(p, latent_dim, hidden=HIDDEN, hid_pad=HIDDEN_PAD):
    """Zero-pad hidden 100->128, fuse the mu|logvar head, bf16 matmul weights."""
    f32, bf16 = jnp.float32, jnp.bfloat16
    pc = lambda w: jnp.pad(w, ((0, 0), (0, hid_pad - hidden)))   # pad out-features
    pr = lambda w: jnp.pad(w, ((0, hid_pad - hidden), (0, 0)))   # pad in-features

    w_enc = pc(p["w_enc"]).astype(bf16)
    b_enc = pc(p["b_enc"]).astype(f32)
    w_mlv = pr(jnp.concatenate([p["w_fc1"], p["w_fc2"]], axis=1)).astype(bf16)
    b_mlv = jnp.concatenate([p["b_fc1"], p["b_fc2"]], axis=1).astype(f32)
    w_dec1 = pc(p["w_dec1"]).astype(bf16)
    b_dec1 = pc(p["b_dec1"]).astype(f32)
    w_dec2_row = pc(p["w_dec2"].T).astype(f32)      # (1, hid_pad)
    b_dec2 = p["b_dec2"].astype(f32)
    w_fz = pc(p["w_fair1_z"]).astype(bf16)
    w_fa_row = pc(p["w_fair1_a"]).astype(f32)       # (1, hid_pad)
    b_f1 = pc(p["b_fair1"]).astype(f32)
    w_f2_row = pc(p["w_fair2"].T).astype(f32)       # (1, hid_pad)
    b_f2 = p["b_fair2"].astype(f32)

    return (w_enc, b_enc, w_mlv, b_mlv, w_dec1, b_dec1, w_dec2_row, b_dec2,
            w_fz, w_fa_row, b_f1, w_f2_row, b_f2)


def vae_tabular_forward(x, a, eps, params):
    B, input_dim = x.shape
    latent = eps.shape[1]
    out_w = 2 * latent + 2

    # Batch tiling: grid over the batch, weights resident across steps.
    tile_b = min(MAX_TILE_B, _round_up(B, 8))
    b_pad = _round_up(B, tile_b)

    def pad_batch(arr):
        return jnp.pad(arr, ((0, b_pad - B), (0, 0))) if b_pad != B else arr

    x_p = pad_batch(x.astype(jnp.bfloat16))
    a_p = pad_batch(a.reshape(B, 1).astype(jnp.float32))
    eps_p = pad_batch(eps.astype(jnp.bfloat16))
    weights = pack_params(params, latent)

    batch_spec = lambda d: pl.BlockSpec((tile_b, d), lambda i: (i, 0))
    resident_spec = lambda arr: pl.BlockSpec(arr.shape, lambda i: (0, 0))

    in_specs = (
        [batch_spec(input_dim), batch_spec(1), batch_spec(latent)]
        + [resident_spec(w) for w in weights]
    )
    out_specs = pl.BlockSpec((tile_b, out_w), lambda i: (i, 0))

    # Advisory cost estimate (mem-bound kernel; helps XLA schedule neighbours).
    flops = 2 * b_pad * (
        input_dim * HIDDEN_PAD            # encoder trunk
        + HIDDEN_PAD * 2 * latent         # fused mu|logvar head
        + 2 * latent * HIDDEN_PAD         # decoder + fair-decoder L1
        + 2 * HIDDEN_PAD                  # two 1-wide heads (VPU)
    )
    weight_bytes = sum(int(w.size) * w.dtype.itemsize for w in weights)
    bytes_accessed = (
        b_pad * (input_dim * 2 + latent * 2 + 4 + out_w * 4) + weight_bytes
    )
    cost = pl.CostEstimate(
        flops=flops, transcendentals=b_pad * latent, bytes_accessed=bytes_accessed
    )

    packed = pl.pallas_call(
        vae_tabular_kernel,
        out_shape=jax.ShapeDtypeStruct((b_pad, out_w), jnp.float32),
        grid=(b_pad // tile_b,),
        in_specs=in_specs,
        out_specs=out_specs,
        compiler_params=pltpu.CompilerParams(
            dimension_semantics=("parallel",),
        ),
        cost_estimate=cost,
    )(x_p, a_p, eps_p, *weights)

    packed = packed[:B]
    mu = packed[:, :latent]
    logvar = packed[:, latent:2 * latent]
    yhat = packed[:, 2 * latent:2 * latent + 1]
    yfair = packed[:, 2 * latent + 1:2 * latent + 2]
    return yhat, yfair, mu, logvar


def init_params(key, latent_dim, input_dim, hidden=HIDDEN):
    ks = jax.random.split(key, 12)
    s = 0.1

    def w(k, shape):
        return (s * jax.random.normal(k, shape)).astype(jnp.float32)

    w_fair1 = w(ks[8], (latent_dim + 1, hidden))
    return {
        "w_enc":     w(ks[0], (input_dim, hidden)),
        "b_enc":     w(ks[1], (1, hidden)),
        "w_fc1":     w(ks[2], (hidden, latent_dim)),
        "b_fc1":     w(ks[3], (1, latent_dim)),
        "w_fc2":     w(ks[4], (hidden, latent_dim)),
        "b_fc2":     w(ks[5], (1, latent_dim)),
        "w_dec1":    w(ks[6], (latent_dim, hidden)),
        "b_dec1":    w(ks[7], (1, hidden)),
        "w_dec2":    w(ks[9], (hidden, 1)),
        "b_dec2":    w(ks[10], (1, 1)),
        "w_fair1_z": w_fair1[:latent_dim, :],
        "w_fair1_a": w_fair1[latent_dim:, :],   # (1, hidden)
        "b_fair1":   w(ks[11], (1, hidden)),
        "w_fair2":   w(jax.random.fold_in(key, 100), (hidden, 1)),
        "b_fair2":   w(jax.random.fold_in(key, 101), (1, 1)),
    }


def reference_forward(x, a, eps, p):
    """Pure-JAX reference mirroring the kernel's dtype strategy exactly
    (bf16 matmul inputs, f32 accumulation / elementwise math)."""
    bf16, f32 = jnp.bfloat16, jnp.float32
    dot = functools.partial(jnp.dot, preferred_element_type=f32)

    xb = x.astype(bf16)
    h = jnp.maximum(dot(xb, p["w_enc"].astype(bf16)) + p["b_enc"], 0.0)
    hb = h.astype(bf16)
    mu = dot(hb, p["w_fc1"].astype(bf16)) + p["b_fc1"]
    logvar = dot(hb, p["w_fc2"].astype(bf16)) + p["b_fc2"]
    eps32 = eps.astype(bf16).astype(f32)
    z = mu + jnp.exp(0.5 * logvar) * eps32
    zb = z.astype(bf16)

    hd = jnp.maximum(dot(zb, p["w_dec1"].astype(bf16)) + p["b_dec1"], 0.0)
    yhat = jnp.sum(hd * p["w_dec2"].T, axis=-1, keepdims=True) + p["b_dec2"]

    hf = jnp.maximum(
        dot(zb, p["w_fair1_z"].astype(bf16))
        + a.reshape(-1, 1) * p["w_fair1_a"]
        + p["b_fair1"],
        0.0,
    )
    yfair = jnp.sum(hf * p["w_fair2"].T, axis=-1, keepdims=True) + p["b_fair2"]
    return yhat, yfair, mu, logvar


def _run_and_check(B, input_dim, latent_dim, key):
    kx, ka, keps, kp = jax.random.split(key, 4)
    x = jax.random.normal(kx, (B, input_dim), dtype=jnp.float32)
    a = (jax.random.uniform(ka, (B,)) > 0.5).astype(jnp.float32)
    eps = jax.random.normal(keps, (B, latent_dim), dtype=jnp.float32)
    params = init_params(kp, latent_dim, input_dim)

    outs = jax.block_until_ready(vae_tabular_forward(x, a, eps, params))
    refs = reference_forward(x, a, eps, params)
    for o, r in zip(outs, refs):
        assert o.shape == r.shape, (o.shape, r.shape)
        assert jnp.allclose(o, r, atol=1e-3, rtol=1e-3), "mismatch vs reference"


if __name__ == "__main__":
    key = jax.random.PRNGKey(0)
    # Small demo shapes consistent with the module (tabular data).
    _run_and_check(B=8, input_dim=32, latent_dim=16, key=key)
    # Exercise the batch-padding / tiling path with a non-multiple-of-8 batch.
    _run_and_check(B=20, input_dim=32, latent_dim=16, key=jax.random.fold_in(key, 1))
    print("KERNEL_OK")
</pallas_src>

<mosaic_0001>
module attributes {stable_mosaic.version = 11 : i64} {
  func.func @vae_tabular_kernel(%arg0: i32, %arg1: memref<8x32xbf16, #tpu.memory_space<vmem>>, %arg2: memref<8x1xf32, #tpu.memory_space<vmem>>, %arg3: memref<8x16xbf16, #tpu.memory_space<vmem>>, %arg4: memref<32x128xbf16, #tpu.memory_space<vmem>>, %arg5: memref<1x128xf32, #tpu.memory_space<vmem>>, %arg6: memref<128x32xbf16, #tpu.memory_space<vmem>>, %arg7: memref<1x32xf32, #tpu.memory_space<vmem>>, %arg8: memref<16x128xbf16, #tpu.memory_space<vmem>>, %arg9: memref<1x128xf32, #tpu.memory_space<vmem>>, %arg10: memref<1x128xf32, #tpu.memory_space<vmem>>, %arg11: memref<1x1xf32, #tpu.memory_space<vmem>>, %arg12: memref<16x128xbf16, #tpu.memory_space<vmem>>, %arg13: memref<1x128xf32, #tpu.memory_space<vmem>>, %arg14: memref<1x128xf32, #tpu.memory_space<vmem>>, %arg15: memref<1x128xf32, #tpu.memory_space<vmem>>, %arg16: memref<1x1xf32, #tpu.memory_space<vmem>>, %arg17: memref<8x34xf32, #tpu.memory_space<vmem>>) attributes {dimension_semantics = [#tpu.dimension_semantics<parallel>], iteration_bounds = array<i64: 1>, scalar_prefetch = 0 : i64, scratch_operands = 0 : i64, tpu.core_type = #tpu.core_type<tc>, window_params = [{transform_indices = @transform_0, window_bounds = array<i64: 8, 32>}, {transform_indices = @transform_1, window_bounds = array<i64: 8, 1>}, {transform_indices = @transform_2, window_bounds = array<i64: 8, 16>}, {pipeline_mode = #tpu.pipeline_mode<synchronous>, transform_indices = @transform_3, window_bounds = array<i64: 32, 128>}, {pipeline_mode = #tpu.pipeline_mode<synchronous>, transform_indices = @transform_4, window_bounds = array<i64: 1, 128>}, {pipeline_mode = #tpu.pipeline_mode<synchronous>, transform_indices = @transform_5, window_bounds = array<i64: 128, 32>}, {pipeline_mode = #tpu.pipeline_mode<synchronous>, transform_indices = @transform_6, window_bounds = array<i64: 1, 32>}, {pipeline_mode = #tpu.pipeline_mode<synchronous>, transform_indices = @transform_7, window_bounds = array<i64: 16, 128>}, {pipeline_mode = #tpu.pipeline_mode<synchronous>, transform_indices = @transform_8, window_bounds = array<i64: 1, 128>}, {pipeline_mode = #tpu.pipeline_mode<synchronous>, transform_indices = @transform_9, window_bounds = array<i64: 1, 128>}, {pipeline_mode = #tpu.pipeline_mode<synchronous>, transform_indices = @transform_10, window_bounds = array<i64: 1, 1>}, {pipeline_mode = #tpu.pipeline_mode<synchronous>, transform_indices = @transform_11, window_bounds = array<i64: 16, 128>}, {pipeline_mode = #tpu.pipeline_mode<synchronous>, transform_indices = @transform_12, window_bounds = array<i64: 1, 128>}, {pipeline_mode = #tpu.pipeline_mode<synchronous>, transform_indices = @transform_13, window_bounds = array<i64: 1, 128>}, {pipeline_mode = #tpu.pipeline_mode<synchronous>, transform_indices = @transform_14, window_bounds = array<i64: 1, 128>}, {pipeline_mode = #tpu.pipeline_mode<synchronous>, transform_indices = @transform_15, window_bounds = array<i64: 1, 1>}, {transform_indices = @transform_16, window_bounds = array<i64: 8, 34>}]} {
    %c0 = arith.constant 0 : index
    %c0_0 = arith.constant 0 : index
    %0 = vector.load %arg1[%c0, %c0_0] : memref<8x32xbf16, #tpu.memory_space<vmem>>, vector<8x32xbf16>
    %c0_1 = arith.constant 0 : index
    %c0_2 = arith.constant 0 : index
    %1 = vector.load %arg2[%c0_1, %c0_2] : memref<8x1xf32, #tpu.memory_space<vmem>>, vector<8x1xf32>
    %c0_3 = arith.constant 0 : index
    %c0_4 = arith.constant 0 : index
    %2 = vector.load %arg3[%c0_3, %c0_4] : memref<8x16xbf16, #tpu.memory_space<vmem>>, vector<8x16xbf16>
    %3 = arith.extf %2 : vector<8x16xbf16> to vector<8x16xf32>
    %c0_5 = arith.constant 0 : index
    %c0_6 = arith.constant 0 : index
    %4 = vector.load %arg4[%c0_5, %c0_6] : memref<32x128xbf16, #tpu.memory_space<vmem>>, vector<32x128xbf16>
    %cst = arith.constant dense<0.000000e+00> : vector<8x128xf32>
    %5 = tpu.matmul %0, %4, %cst {dimension_numbers = #tpu.dot_dimension_numbers<[1], [0], [0], [1], [0, 0, 1, 1], [], []>} : vector<8x32xbf16>, vector<32x128xbf16>, vector<8x128xf32> -> vector<8x128xf32>
    %c0_7 = arith.constant 0 : index
    %c0_8 = arith.constant 0 : index
    %6 = vector.load %arg5[%c0_7, %c0_8] : memref<1x128xf32, #tpu.memory_space<vmem>>, vector<1x128xf32>
    %7 = vector.broadcast %6 : vector<1x128xf32> to vector<8x128xf32>
    %8 = arith.addf %5, %7 : vector<8x128xf32>
    %cst_9 = arith.constant 0.000000e+00 : f32
    %9 = vector.broadcast %cst_9 : f32 to vector<8x128xf32>
    %10 = arith.maximumf %8, %9 : vector<8x128xf32>
    %11 = arith.truncf %10 : vector<8x128xf32> to vector<8x128xbf16>
    %c0_10 = arith.constant 0 : index
    %c0_11 = arith.constant 0 : index
    %12 = vector.load %arg6[%c0_10, %c0_11] : memref<128x32xbf16, #tpu.memory_space<vmem>>, vector<128x32xbf16>
    %cst_12 = arith.constant dense<0.000000e+00> : vector<8x32xf32>
    %13 = tpu.matmul %11, %12, %cst_12 {dimension_numbers = #tpu.dot_dimension_numbers<[1], [0], [0], [1], [0, 0, 1, 1], [], []>} : vector<8x128xbf16>, vector<128x32xbf16>, vector<8x32xf32> -> vector<8x32xf32>
    %c0_13 = arith.constant 0 : index
    %c0_14 = arith.constant 0 : index
    %14 = vector.load %arg7[%c0_13, %c0_14] : memref<1x32xf32, #tpu.memory_space<vmem>>, vector<1x32xf32>
    %15 = vector.broadcast %14 : vector<1x32xf32> to vector<8x32xf32>
    %16 = arith.addf %13, %15 : vector<8x32xf32>
    %17 = vector.extract_strided_slice %16 {offsets = [0, 0], sizes = [8, 16], strides = [1, 1]} : vector<8x32xf32> to vector<8x16xf32>
    %18 = vector.extract_strided_slice %16 {offsets = [0, 16], sizes = [8, 16], strides = [1, 1]} : vector<8x32xf32> to vector<8x16xf32>
    %cst_15 = arith.constant 5.000000e-01 : f32
    %19 = vector.broadcast %cst_15 : f32 to vector<8x16xf32>
    %20 = arith.mulf %19, %18 : vector<8x16xf32>
    %21 = math.exp %20 : vector<8x16xf32>
    %22 = arith.mulf %21, %3 : vector<8x16xf32>
    %23 = arith.addf %17, %22 : vector<8x16xf32>
    %24 = arith.truncf %23 : vector<8x16xf32> to vector<8x16xbf16>
    %c0_16 = arith.constant 0 : index
    %c0_17 = arith.constant 0 : index
    %25 = vector.load %arg8[%c0_16, %c0_17] : memref<16x128xbf16, #tpu.memory_space<vmem>>, vector<16x128xbf16>
    %cst_18 = arith.constant dense<0.000000e+00> : vector<8x128xf32>
    %26 = tpu.matmul %24, %25, %cst_18 {dimension_numbers = #tpu.dot_dimension_numbers<[1], [0], [0], [1], [0, 0, 1, 1], [], []>} : vector<8x16xbf16>, vector<16x128xbf16>, vector<8x128xf32> -> vector<8x128xf32>
    %c0_19 = arith.constant 0 : index
    %c0_20 = arith.constant 0 : index
    %27 = vector.load %arg9[%c0_19, %c0_20] : memref<1x128xf32, #tpu.memory_space<vmem>>, vector<1x128xf32>
    %28 = vector.broadcast %27 : vector<1x128xf32> to vector<8x128xf32>
    %29 = arith.addf %26, %28 : vector<8x128xf32>
    %cst_21 = arith.constant 0.000000e+00 : f32
    %30 = vector.broadcast %cst_21 : f32 to vector<8x128xf32>
    %31 = arith.maximumf %29, %30 : vector<8x128xf32>
    %c0_22 = arith.constant 0 : index
    %c0_23 = arith.constant 0 : index
    %32 = vector.load %arg10[%c0_22, %c0_23] : memref<1x128xf32, #tpu.memory_space<vmem>>, vector<1x128xf32>
    %33 = vector.broadcast %32 : vector<1x128xf32> to vector<8x128xf32>
    %34 = arith.mulf %31, %33 : vector<8x128xf32>
    %cst_24 = arith.constant dense<0.000000e+00> : vector<8xf32>
    %35 = vector.multi_reduction <add>, %34, %cst_24 [1] : vector<8x128xf32> to vector<8xf32>
    %36 = vector.shape_cast %35 : vector<8xf32> to vector<8x1xf32>
    %c0_25 = arith.constant 0 : index
    %c0_26 = arith.constant 0 : index
    %37 = vector.load %arg11[%c0_25, %c0_26] : memref<1x1xf32, #tpu.memory_space<vmem>>, vector<1x1xf32>
    %38 = vector.broadcast %37 : vector<1x1xf32> to vector<8x1xf32>
    %39 = arith.addf %36, %38 : vector<8x1xf32>
    %c0_27 = arith.constant 0 : index
    %c0_28 = arith.constant 0 : index
    %40 = vector.load %arg12[%c0_27, %c0_28] : memref<16x128xbf16, #tpu.memory_space<vmem>>, vector<16x128xbf16>
    %cst_29 = arith.constant dense<0.000000e+00> : vector<8x128xf32>
    %41 = tpu.matmul %24, %40, %cst_29 {dimension_numbers = #tpu.dot_dimension_numbers<[1], [0], [0], [1], [0, 0, 1, 1], [], []>} : vector<8x16xbf16>, vector<16x128xbf16>, vector<8x128xf32> -> vector<8x128xf32>
    %c0_30 = arith.constant 0 : index
    %c0_31 = arith.constant 0 : index
    %42 = vector.load %arg13[%c0_30, %c0_31] : memref<1x128xf32, #tpu.memory_space<vmem>>, vector<1x128xf32>
    %43 = vector.broadcast %1 : vector<8x1xf32> to vector<8x128xf32>
    %44 = vector.broadcast %42 : vector<1x128xf32> to vector<8x128xf32>
    %45 = arith.mulf %43, %44 : vector<8x128xf32>
    %46 = arith.addf %41, %45 : vector<8x128xf32>
    %c0_32 = arith.constant 0 : index
    %c0_33 = arith.constant 0 : index
    %47 = vector.load %arg14[%c0_32, %c0_33] : memref<1x128xf32, #tpu.memory_space<vmem>>, vector<1x128xf32>
    %48 = vector.broadcast %47 : vector<1x128xf32> to vector<8x128xf32>
    %49 = arith.addf %46, %48 : vector<8x128xf32>
    %cst_34 = arith.constant 0.000000e+00 : f32
    %50 = vector.broadcast %cst_34 : f32 to vector<8x128xf32>
    %51 = arith.maximumf %49, %50 : vector<8x128xf32>
    %c0_35 = arith.constant 0 : index
    %c0_36 = arith.constant 0 : index
    %52 = vector.load %arg15[%c0_35, %c0_36] : memref<1x128xf32, #tpu.memory_space<vmem>>, vector<1x128xf32>
    %53 = vector.broadcast %52 : vector<1x128xf32> to vector<8x128xf32>
    %54 = arith.mulf %51, %53 : vector<8x128xf32>
    %cst_37 = arith.constant dense<0.000000e+00> : vector<8xf32>
    %55 = vector.multi_reduction <add>, %54, %cst_37 [1] : vector<8x128xf32> to vector<8xf32>
    %56 = vector.shape_cast %55 : vector<8xf32> to vector<8x1xf32>
    %c0_38 = arith.constant 0 : index
    %c0_39 = arith.constant 0 : index
    %57 = vector.load %arg16[%c0_38, %c0_39] : memref<1x1xf32, #tpu.memory_space<vmem>>, vector<1x1xf32>
    %58 = vector.broadcast %57 : vector<1x1xf32> to vector<8x1xf32>
    %59 = arith.addf %56, %58 : vector<8x1xf32>
    %60 = tpu.concatenate %16, %39, %59 in 1 : vector<8x32xf32>, vector<8x1xf32>, vector<8x1xf32> -> vector<8x34xf32>
    %c0_40 = arith.constant 0 : index
    %c0_41 = arith.constant 0 : index
    %61 = vector.load %arg17[%c0_40, %c0_41] : memref<8x34xf32, #tpu.memory_space<vmem>>, vector<8x34xf32>
    tpu.vector_store %arg17[%c0_40, %c0_41], %60 {strides = array<i32>} : memref<8x34xf32, #tpu.memory_space<vmem>>, vector<8x34xf32>,
    return
  }
  func.func @transform_0(%arg0: i32) -> (i32, i32) {
    %c0_i32 = arith.constant 0 : i32
    %c0_i32_0 = arith.constant 0 : i32
    return %arg0, %c0_i32 : i32, i32
  }
  func.func @transform_1(%arg0: i32) -> (i32, i32) {
    %c0_i32 = arith.constant 0 : i32
    %c0_i32_0 = arith.constant 0 : i32
    return %arg0, %c0_i32 : i32, i32
  }
  func.func @transform_2(%arg0: i32) -> (i32, i32) {
    %c0_i32 = arith.constant 0 : i32
    %c0_i32_0 = arith.constant 0 : i32
    return %arg0, %c0_i32 : i32, i32
  }
  func.func @transform_3(%arg0: i32) -> (i32, i32) {
    %c0_i32 = arith.constant 0 : i32
    %c0_i32_0 = arith.constant 0 : i32
    %c0_i32_1 = arith.constant 0 : i32
    return %c0_i32, %c0_i32_0 : i32, i32
  }
  func.func @transform_4(%arg0: i32) -> (i32, i32) {
    %c0_i32 = arith.constant 0 : i32
    %c0_i32_0 = arith.constant 0 : i32
    %c0_i32_1 = arith.constant 0 : i32
    return %c0_i32, %c0_i32_0 : i32, i32
  }
  func.func @transform_5(%arg0: i32) -> (i32, i32) {
    %c0_i32 = arith.constant 0 : i32
    %c0_i32_0 = arith.constant 0 : i32
    %c0_i32_1 = arith.constant 0 : i32
    return %c0_i32, %c0_i32_0 : i32, i32
  }
  func.func @transform_6(%arg0: i32) -> (i32, i32) {
    %c0_i32 = arith.constant 0 : i32
    %c0_i32_0 = arith.constant 0 : i32
    %c0_i32_1 = arith.constant 0 : i32
    return %c0_i32, %c0_i32_0 : i32, i32
  }
  func.func @transform_7(%arg0: i32) -> (i32, i32) {
    %c0_i32 = arith.constant 0 : i32
    %c0_i32_0 = arith.constant 0 : i32
    %c0_i32_1 = arith.constant 0 : i32
    return %c0_i32, %c0_i32_0 : i32, i32
  }
  func.func @transform_8(%arg0: i32) -> (i32, i32) {
    %c0_i32 = arith.constant 0 : i32
    %c0_i32_0 = arith.constant 0 : i32
    %c0_i32_1 = arith.constant 0 : i32
    return %c0_i32, %c0_i32_0 : i32, i32
  }
  func.func @transform_9(%arg0: i32) -> (i32, i32) {
    %c0_i32 = arith.constant 0 : i32
    %c0_i32_0 = arith.constant 0 : i32
    %c0_i32_1 = arith.constant 0 : i32
    return %c0_i32, %c0_i32_0 : i32, i32
  }
  func.func @transform_10(%arg0: i32) -> (i32, i32) {
    %c0_i32 = arith.constant 0 : i32
    %c0_i32_0 = arith.constant 0 : i32
    %c0_i32_1 = arith.constant 0 : i32
    return %c0_i32, %c0_i32_0 : i32, i32
  }
  func.func @transform_11(%arg0: i32) -> (i32, i32) {
    %c0_i32 = arith.constant 0 : i32
    %c0_i32_0 = arith.constant 0 : i32
    %c0_i32_1 = arith.constant 0 : i32
    return %c0_i32, %c0_i32_0 : i32, i32
  }
  func.func @transform_12(%arg0: i32) -> (i32, i32) {
    %c0_i32 = arith.constant 0 : i32
    %c0_i32_0 = arith.constant 0 : i32
    %c0_i32_1 = arith.constant 0 : i32
    return %c0_i32, %c0_i32_0 : i32, i32
  }
  func.func @transform_13(%arg0: i32) -> (i32, i32) {
    %c0_i32 = arith.constant 0 : i32
    %c0_i32_0 = arith.constant 0 : i32
    %c0_i32_1 = arith.constant 0 : i32
    return %c0_i32, %c0_i32_0 : i32, i32
  }
  func.func @transform_14(%arg0: i32) -> (i32, i32) {
    %c0_i32 = arith.constant 0 : i32
    %c0_i32_0 = arith.constant 0 : i32
    %c0_i32_1 = arith.constant 0 : i32
    return %c0_i32, %c0_i32_0 : i32, i32
  }
  func.func @transform_15(%arg0: i32) -> (i32, i32) {
    %c0_i32 = arith.constant 0 : i32
    %c0_i32_0 = arith.constant 0 : i32
    %c0_i32_1 = arith.constant 0 : i32
    return %c0_i32, %c0_i32_0 : i32, i32
  }
  func.func @transform_16(%arg0: i32) -> (i32, i32) {
    %c0_i32 = arith.constant 0 : i32
    %c0_i32_0 = arith.constant 0 : i32
    return %arg0, %c0_i32 : i32, i32
  }
}

</mosaic_0001>

<bundles_post_ra>
// kernel: tpu_custom_call.1
= control target key start
LH: loop header
LB: loop body
LE: loop exit
PB: predicated region body
PF: predicated region fallthrough
CT: control target
= control target key end

     0   :  { %s771_s0 = inlined_call_operand.vmem [shape: bf16[8,32], index: 0, kind: input, shape index: {}]   ;;  %s772_s1 = inlined_call_operand.vmem [shape: f32[8,1], index: 1, kind: input, shape index: {}]   ;;  %s773_s2 = inlined_call_operand.vmem [shape: bf16[8,16], index: 2, kind: input, shape index: {}]   ;;  %s774_s3 = inlined_call_operand.vmem [shape: bf16[32,128], index: 3, kind: input, shape index: {}]   ;;  %s775_s4 = inlined_call_operand.vmem [shape: f32[1,128], index: 4, kind: input, shape index: {}]   ;;  %s776_s5 = inlined_call_operand.vmem [shape: bf16[128,32], index: 5, kind: input, shape index: {}]   ;;  %s777_s6 = inlined_call_operand.vmem [shape: f32[1,32], index: 6, kind: input, shape index: {}]   ;;  %s778_s7 = inlined_call_operand.vmem [shape: bf16[16,128], index: 7, kind: input, shape index: {}]   ;;  %s779_s8 = inlined_call_operand.vmem [shape: f32[1,128], index: 8, kind: input, shape index: {}]   ;;  %s780_s9 = inlined_call_operand.vmem [shape: f32[1,128], index: 9, kind: input, shape index: {}]   ;;  %s781_s10 = inlined_call_operand.<no memory space> [shape: f32[1,1], index: 10, kind: input, shape index: {}]   ;;  %s782_s11 = inlined_call_operand.vmem [shape: bf16[16,128], index: 11, kind: input, shape index: {}]   ;;  %s783_s12 = inlined_call_operand.vmem [shape: f32[1,128], index: 12, kind: input, shape index: {}]   ;;  %s784_s13 = inlined_call_operand.vmem [shape: f32[1,128], index: 13, kind: input, shape index: {}]   ;;  %s785_s14 = inlined_call_operand.vmem [shape: f32[1,128], index: 14, kind: input, shape index: {}]   ;;  %s786_s16 = inlined_call_operand.hbm [shape: f32[8,34], index: 16, kind: output, shape index: {}]   ;;  %s787_s15 = inlined_call_operand.<no memory space> [shape: f32[1,1], index: 15, kind: input, shape index: {}]  }
   0x1   :  { %788 = sst [smem:[#allocation7_spill]] %s771_s0  ;;  %v21_v0 = vstv %s781_s10  ;;  %v23_v1 = vstv %s787_s15 }
   0x2   :  { %22 = vst [vmem:[#allocation2] sm:$0x1] %v21_v0  ;;  %24 = vst [vmem:[#allocation3] sm:$0x1] %v23_v1 }
   0x3   :  { %v540_v2 = vld [vmem:[%s774_s3 + $0x8] sm:$0xff]   ;;  %v576_v3 = vmov 0.0   ;;  %v541_v4 = vld [vmem:[%s774_s3] sm:$0xff]   ;;  %vm577_vm0 = vmmov 0   ;;  %v542_v5 = vld [vmem:[%s776_s5 + $0x38] sm:$0xff]   ;;  %s789_s17 = sld [smem:[#allocation7_spill]] }
   0x4   :  { %490 = vmatprep.subr.bf16.mxu0 %v576_v3  ;;  %498 = vmatprep.subr.bf16.mxu1 %v576_v3  ;;  %v543_v6 = vld [vmem:[%s776_s5 + $0x30] sm:$0xff]   ;;  %vm86_vm1 = vcmask 261120   ;;  %v544_v8 = vld [vmem:[%s776_s5 + $0x28] sm:$0xff]  }
   0x5   :  { %491 = vmatpush3.bf16.msra.mxu0 %v540_v2  ;;  %494 = vmatprep.mubr.msk.bf16.mxu0 %vm577_vm0, %v576_v3 }
   0x6   :  { %492 = vmatprep.subr.bf16.mxu0 %v576_v3  ;;  %514 = vmatprep.mubr.msk.bf16.mxu1 %vm577_vm0, %v576_v3 }
   0x7   :  { %499 = vmatpush3.bf16.msra.mxu1 %v542_v5 }
   0x8   :  { %500 = vmatprep.subr.bf16.mxu1 %v576_v3 }
   0x9   :  { %v59_v7 = vld [vmem:[%s789_s17] sm:$0xf]  ;;  %493 = vmatpush3.bf16.msra.mxu0 %v541_v4 }
   0xa   :  { %518 = vmatprep.subr.bf16.mxu0 %v576_v3 }
   0xb   :  { %501 = vmatpush3.bf16.msra.mxu1 %v543_v6 }
   0xc   :  { %495 = vmatmul.mubr.msk.bf16.vlgmr.msra.gmra.mxu0 %vm86_vm1, %v59_v7  ;;  %502 = vmatprep.subr.bf16.mxu1 %v576_v3 }
   0xd   :  { %520 = vmatprep.mubr.msk.bf16.mxu0 %vm577_vm0, %v576_v3 }
   0xe   :  { %25 = vsyncpa [#allocation5], 0  ;;  %v545_v9 = vld [vmem:[%s776_s5 + $0x20] sm:$0xff]   ;;  %v546_v10 = vld [vmem:[%s776_s5 + $0x18] sm:$0xff]   ;;  %s578_s30 = smov 16   ;;  %s579_s19 = smov 112  }
   0xf   :  { %503 = vmatpush3.bf16.msra.mxu1 %v544_v8  ;;  %v547_v11 = vld [vmem:[%s776_s5 + $0x10] sm:$0xff]   ;;  %v548_v12 = vld [vmem:[%s776_s5 + $0x8] sm:$0xff]   ;;  %v549_v13 = vld [vmem:[%s776_s5] sm:$0xff]   ;;  %v580_v37 = vmov 0   ;;  %vm272_vm2 = vcmask 130048   ;;  %s583_s27 = smov [#allocation4]  }
  0x10   :  { %504 = vmatprep.subr.bf16.mxu1 %v576_v3  ;;  %v61_v14 = vld [vmem:[%s773_s2] sm:$0xf]  ;;  %538 = vset.pattern.permute.xlu1 %v580_v37  ;;  %s442_s28 = sshll.u32 %s583_s27, 4  ;;  %vm432_vm3 = vcmask 269312   ;;  %vm434_vm4 = vcmask 277504   ;;  %s443_s28 = int_to_ptr.vmem [resolvable:$true] %s442_s28 }
  0x11   :  { %v62_v15 = vunpack.c.l.bf16 %v61_v14  ;;  %v450_v16 = vld [vmem:[%s775_s4] ss:$0 sm:$0xff]  ;;  %539 = vset.pattern.permute.xlu0 %v580_v37  ;;  %p559_p1 = scmp.lt.s32.totalorder %s443_s28, %s443_s28 }
  0x12   :  { %v550_v24 = vld [vmem:[%s778_s7] sm:$0xff]  }
  0x13   :  { %505 = vmatpush3.bf16.msra.mxu1 %v545_v9  ;;  %247 = vrot.lane.b32.xlu0 %v62_v15, %s578_s30  ;;  %v454_v25 = vld [vmem:[%s777_s6] ss:$0 sm:$0xff] }
  0x14   :  { %506 = vmatprep.subr.bf16.mxu1 %v576_v3  ;;  %519 = vmatpush3.bf16.msra.mxu0 %v550_v24  ;;  %v60_v36 = vld [vmem:[%s772_s1] sm:$0xff] }
  0x15   :  { %524 = vmatprep.subr.bf16.mxu0 %v576_v3  ;;  %340 = vperm.xlu1 %538, %v60_v36   ;;  %v551_v40 = vld [vmem:[%s782_s11] sm:$0xff]  }
  0x16   :  { %v463_v42 = vld [vmem:[%s779_s8] ss:$0 sm:$0xff] }
  0x17   :  { %507 = vmatpush3.bf16.msra.mxu1 %v546_v10  ;;  %v468_v46 = vld [vmem:[%s783_s12] ss:$0 sm:$0xff] }
  0x18   :  { %508 = vmatprep.subr.bf16.mxu1 %v576_v3  ;;  %v466_v48 = vld [vmem:[%s780_s9] ss:$0 sm:$0xff]  ;;  %s581_s9 = smov 32  }
  0x19   :  { %v471_v55 = vld [vmem:[%s784_s13] ss:$0 sm:$0xff]  ;;  %s582_s13 = smov 33  }
  0x1a   :  { %v472_v60 = vld [vmem:[%s785_s14] ss:$0 sm:$0xff]  ;;  %s554_s14 = scalar_lea.vmem %s443_s28, 128 }
  0x1b   :  { %509 = vmatpush3.bf16.msra.mxu1 %v547_v11  ;;  %v467_v0 = vld [vmem:[#allocation2] ss:$0 sm:$0xff]  ;;  %p555_p0 = scmp.ne.s32.totalorder %s443_s28, %s554_s14  ;;  %p560_p2 = scmp.lt.s32.totalorder %s554_s14, %s554_s14 }
  0x1c   :  { %510 = vmatprep.subr.bf16.mxu1 %v576_v3 }
  0x1d   :  { %p561_p3 = por %p560_p2, %p559_p1 }
  0x1f   :  { %511 = vmatpush3.bf16.msra.mxu1 %v548_v12  ;;  %p562_p4 = pnand %p561_p3, %p555_p0 }
  0x20   :  { %512 = vmatprep.subr.bf16.mxu1 %v576_v3 }
  0x23   :  { %513 = vmatpush3.bf16.msra.mxu1 %v549_v13 }
  0x85   :  { %v248_v33 = vpop.permute.xlu0 %247 }
  0x90   :  { %v341_v47 = vpop.permute.xlu1 %340 }
  0x91   :  { %v349_v51 = vmul.f32 %v468_v46, %v341_v47 }
  0xcc   :  { %v124_v17 = vpop.f32.mrf.mxu0 }
  0xcd   :  { %v125_v18 = vadd.f32 %v450_v16, %v124_v17 }
  0xce   :  { %v496_v19 = vpop.f32.mrf.mxu0 }
  0xcf   :  { %v130_v20 = vmax.f32 %v125_v18, 0.0 }
  0xd0   :  { %v127_v21 = vpop.f32.mrf.mxu0 }
  0xd1   :  { %v131_v22 = vpack.c.bf16 %v130_v20, %v130_v20 }
  0xd2   :  { %v497_v23 = vpop.f32.mrf.mxu0 }
  0xd3   :  { %515 = vmatmul.mubr.bf16.vlgmr.msra.gmra.mxu1 %v131_v22 }
 0x193   :  { %v237_v26 = vpop.f32.mrf.mxu1 }
 0x194   :  { %v739_v27 = vadd.f32 %v454_v25, %v237_v26 }
 0x195   :  { %v516_v28 = vpop.f32.mrf.mxu1 }
 0x196   :  { %v243_v29 = vmul.f32 0.5, %v739_v27 }
 0x197   :  { %v240_v30 = vpop.f32.mrf.mxu1 }
 0x198   :  { %v244_v31 = vmul.f32 1.442695, %v243_v29 }
 0x199   :  { %v517_v32 = vpop.f32.mrf.mxu1 }
 0x19a   :  { %552 = vpow2.f32 %v244_v31 }
 0x1a7   :  { %v553_v34 = vpop.eup %552 }
 0x1a8   :  { %v250_v35 = vmul.f32 %v553_v34, %v248_v33 }
 0x1aa   :  { %252 = vrot.lane.b32.xlu0 %v250_v35, %s579_s19 }
 0x21c   :  { %v253_v38 = vpop.permute.xlu0 %252 }
 0x21d   :  { %v255_v39 = vadd.f32 %v253_v38, %v739_v27 }
 0x21f   :  { %v256_v41 = vpack.c.bf16 %v255_v39, %v255_v39 }
 0x221   :  { %521 = vmatmul.mubr.msk.bf16.vlgmr.msra.gmra.mxu0 %vm272_vm2, %v256_v41 }
 0x222   :  { %525 = vmatpush3.bf16.msra.mxu0 %v551_v40  ;;  %526 = vmatprep.mubr.msk.bf16.mxu0 %vm577_vm0, %v576_v3  ;;  %v473_v3 = vld [vmem:[#allocation3] ss:$0 sm:$0xff] }
 0x229   :  { %527 = vmatmul.mubr.msk.bf16.vlgmr.msra.gmra.mxu0 %vm272_vm2, %v256_v41 }
 0x2e1   :  { %v310_v43 = vpop.f32.mrf.mxu0 }
 0x2e2   :  { %v311_v44 = vadd.f32 %v463_v42, %v310_v43 }
 0x2e3   :  { %v522_v45 = vpop.f32.mrf.mxu0 }
 0x2e4   :  { %v316_v49 = vmax.f32 %v311_v44, 0.0 }
 0x2e5   :  { %v313_v50 = vpop.f32.mrf.mxu0 }
 0x2e6   :  { %v324_v52 = vmul.f32 %v466_v48, %v316_v49 }
 0x2e7   :  { %v523_v53 = vpop.f32.mrf.mxu0 }
 0x2e8   :  { %325 = vadd.xlane.f32.xlu1 %v324_v52 }
 0x2e9   :  { %v390_v54 = vpop.f32.mrf.mxu0 }
 0x2ea   :  { %v391_v56 = vadd.f32 %v390_v54, %v349_v51 }
 0x2eb   :  { %v528_v57 = vpop.f32.mrf.mxu0 }
 0x2ec   :  { %v403_v58 = vadd.f32 %v471_v55, %v391_v56 }
 0x2ed   :  { %v393_v59 = vpop.f32.mrf.mxu0 }
 0x2ee   :  { %v404_v61 = vmax.f32 %v403_v58, 0.0 }
 0x2ef   :  { %v529_v62 = vpop.f32.mrf.mxu0 }
 0x2f0   :  { %v412_v63 = vmul.f32 %v472_v60, %v404_v61 }
 0x2f2   :  { %413 = vadd.xlane.f32.xlu0 %v412_v63 }
 0x371   :  { %v326_v1 = vpop.xlane.xlu1 %325 }
 0x372   :  { %v334_v2 = vadd.f32 %v467_v0, %v326_v1 }
 0x374   :  { %424 = vrot.lane.b32.xlu0 %v334_v2, %s581_s9 }
 0x37b   :  { %v414_v4 = vpop.xlane.xlu0 %413 }
 0x37c   :  { %v422_v5 = vadd.f32 %v473_v3, %v414_v4 }
 0x37e   :  { %428 = vrot.lane.b32.xlu1 %v422_v5, %s582_s13 }
 0x3e6   :  { %v425_v6 = vpop.permute.xlu0 %424 }
 0x3e7   :  { %v431_v7 = vsel %vm86_vm1, %v739_v27, %v425_v6 }
 0x3f0   :  { %v429_v8 = vpop.permute.xlu1 %428 }
 0x3f1   :  { %v433_v9 = vsel %vm432_vm3, %v431_v7, %v429_v8 }
 0x3f2   :  { %435 = vst.msk [vmem:[#allocation4] sm:$0xff] %vm434_vm4, %v433_v9 }
 0x3f3   :  { %565 = shalt.err (!%p562_p4)
}
 0x3f4   :  { %445 = dma.vmem_to_hbm [thread:$0]  %s443_s28, 128, %s786_s16, [#allocation5]  }
 0x3f5   :  { %574 = dma.done.wait [#allocation5], 128  }
 0x3f6   :  { %575 = vsyncadd [#allocation5], 4294967168 }
 0x3f7   :  { %449 = vsyncpa [#allocation5], 1 }

</bundles_post_ra>
